<compile_context>
chip_gen: v7x
topology: tpu7x:2x2x1
jax: 0.10.0
libtpu: 0.0.40
codegen_flags: <defaults>
</compile_context>

<pallas_src>
import functools

import jax
import jax.numpy as jnp
from jax.experimental import pallas as pl
from jax.experimental.pallas import tpu as pltpu

_LANES = 128
_TILE_CANDIDATES = (1024, 768, 512, 384, 256, 192, 128, 96, 64, 48, 32, 24, 16, 8)


def _kd_partials_kernel(s_ref, t_ref, tgt_ref, out_ref, *,
                        temperature, valid_rows, rows_padded, use_mxu):
    """Per-batch-tile partial sums. Output block row = [KL partial | CE partial]."""
    s = s_ref[...].astype(jnp.float32)          # (Bt, C) student logits (f32 math)
    t = t_ref[...].astype(jnp.float32)          # (Bt, C) teacher logits
    bt, c = s.shape

    if use_mxu:
        # Row reductions on the otherwise-idle MXU (v7x: VALU is the binding slot).
        ones = jnp.ones((c, _LANES), dtype=jnp.float32)

        def row_sum(x):
            r = jnp.dot(x, ones, precision=jax.lax.Precision.HIGHEST,
                        preferred_element_type=jnp.float32)
            return r[:, 0:1]
    else:
        def row_sum(x):
            return jnp.sum(x, axis=1, keepdims=True)

    inv_t = jnp.float32(1.0 / temperature)

    # ---- student log-softmax statistics at T = 1 (hard CE path) ----
    s1_max = jnp.max(s, axis=1, keepdims=True)
    s1_shift = s - s1_max
    s1_lse = jnp.log(row_sum(jnp.exp(s1_shift)))

    # ---- student log-softmax at temperature T, reusing the T=1 shift:
    #      max(s/T) = max(s)/T  =>  (s/T) - max(s/T) = s1_shift * (1/T)
    if temperature == 1.0:
        log_p_s_T = s1_shift - s1_lse           # reuse: one fewer exp/log per row
    else:
        s_shift = s1_shift * inv_t              # no second row-max / subtract needed
        s_lse = jnp.log(row_sum(jnp.exp(s_shift)))
        log_p_s_T = s_shift - s_lse

    # ---- teacher softmax at temperature T (un-normalized exp kept) ----
    ts = t * inv_t
    t_max = jnp.max(ts, axis=1, keepdims=True)
    t_shift = ts - t_max
    t_exp = jnp.exp(t_shift)
    t_sum = row_sum(t_exp)
    log_t_sum = jnp.log(t_sum)

    # KL rows with 1/t_sum factored OUT of the (Bt, C) reduction:
    #   kl_row = (1/t_sum) * sum_C t_exp * ((t_shift - log_t_sum) - log_p_s_T)
    diff = (t_shift - log_p_s_T) - log_t_sum
    kl_rows = row_sum(t_exp * diff) / t_sum     # exact per-row divide, (Bt, 1)

    # ---- hard cross-entropy: pick from the RAW logits (shorter s1_shift live range)
    #      ce_row = s1_lse + s1_max - s[target]
    tgt = tgt_ref[...]                          # (Bt, 1) int32 class ids
    col = jax.lax.broadcasted_iota(jnp.int32, (bt, c), 1)
    picked = row_sum(jnp.where(col == tgt, s, 0.0))
    ce_rows = (s1_lse + s1_max) - picked

    if rows_padded > valid_rows:
        # Zero the contribution of padded rows (batch padded to a tile multiple).
        row0 = pl.program_id(0) * bt
        rid = row0 + jax.lax.broadcasted_iota(jnp.int32, (bt, 1), 0)
        valid = rid < valid_rows
        kl_rows = jnp.where(valid, kl_rows, 0.0)
        ce_rows = jnp.where(valid, ce_rows, 0.0)

    kl_part = jnp.sum(kl_rows)
    ce_part = jnp.sum(ce_rows)

    # 8-sublane, 128-lane dense, unmasked stores.
    out_ref[:, 0:_LANES] = jnp.full((8, _LANES), kl_part, dtype=jnp.float32)
    out_ref[:, _LANES:2 * _LANES] = jnp.full((8, _LANES), ce_part, dtype=jnp.float32)


def _tpu_config():
    """Best-effort generation-aware config: (vmem_limit_bytes, tile_budget, is_v7x)."""
    vmem_cap = None
    try:
        info = pltpu.get_tpu_info()
        vmem_cap = getattr(info, "vmem_capacity_bytes", None)
    except Exception:
        vmem_cap = None
    kind = ""
    try:
        kind = jax.devices()[0].device_kind.lower()
    except Exception:
        kind = ""
    is_v7x = ("v7" in kind) or ("7x" in kind)
    if not vmem_cap:
        vmem_cap = (64 << 20) if is_v7x else (128 << 20)
    # Explicit scoped-VMEM limit: v5e's *default* is only 16 MiB, so always set it.
    vmem_limit = min(int(vmem_cap * 3 // 4), 100 << 20)   # ~96 MiB v5e/v6e, ~48 MiB v7x
    tile_budget = int(vmem_limit * 0.6)                    # working-set target per step
    return vmem_limit, tile_budget, is_v7x


def _pick_batch_tile(batch, num_classes, in_itemsize, budget, use_mxu):
    """Pick (batch_tile, padded_batch): largest multiple-of-8 tile whose
    double-buffered inputs + ~10 full-width f32 temporaries fit `budget`."""
    bytes_per_row = num_classes * (2 * 2 * in_itemsize + 10 * 4)
    fixed = (_LANES * 4 * num_classes) if use_mxu else 0   # in-kernel ones((C,128)) f32
    max_rows = max(8, int((budget - fixed) // max(bytes_per_row, 1)))
    b8 = ((batch + 7) // 8) * 8
    tile_cap = max(8, min((max_rows // 8) * 8, 1024))
    if b8 <= tile_cap:
        return b8, b8                                       # whole batch in one block
    for cand in _TILE_CANDIDATES:                           # prefer an exact divisor
        if cand <= tile_cap and cand * 4 >= tile_cap and b8 % cand == 0:
            return cand, b8
    padded = ((b8 + tile_cap - 1) // tile_cap) * tile_cap   # else pad to tile multiple
    return tile_cap, padded


def distillation_loss(student_logits, teacher_logits, targets,
                      temperature=3.0, alpha=0.5,
                      use_mxu_reduce=None, tile_budget_bytes=None):
    """Pallas TPU implementation of DistillationLoss.forward (returns a scalar).

    Inputs may be bf16 (recommended on HBM-bound v5e / f32-v6e deployments);
    all internal math is f32.
    """
    b, c = student_logits.shape
    vmem_limit, tile_budget, is_v7x = _tpu_config()
    if tile_budget_bytes is not None:
        tile_budget = int(tile_budget_bytes)
    if use_mxu_reduce is None:
        use_mxu_reduce = is_v7x          # MXU row-sum offload only where VALU binds

    in_itemsize = jnp.dtype(student_logits.dtype).itemsize
    b_tile, b_pad = _pick_batch_tile(b, c, in_itemsize, tile_budget, use_mxu_reduce)
    num_tiles = b_pad // b_tile
    # TODO(synk): class-axis (vocab) tiling with online max/LSE accumulation for very
    # large C (>~64k f32) so a single row block never exceeds VMEM, esp. on v7x.

    tgt2d = targets.astype(jnp.int32).reshape(b, 1)
    s_in, t_in = student_logits, teacher_logits
    if b_pad > b:
        pad = ((0, b_pad - b), (0, 0))
        s_in = jnp.pad(s_in, pad)
        t_in = jnp.pad(t_in, pad)
        tgt2d = jnp.pad(tgt2d, pad)

    kernel = functools.partial(
        _kd_partials_kernel,
        temperature=float(temperature),
        valid_rows=b, rows_padded=b_pad,
        use_mxu=bool(use_mxu_reduce))

    n_trans = (2 if float(temperature) == 1.0 else 3) * b_pad * c
    cost = pl.CostEstimate(
        flops=15 * b_pad * c,
        transcendentals=n_trans,
        bytes_accessed=2 * b_pad * c * in_itemsize + b_pad * 4
        + num_tiles * 8 * 2 * _LANES * 4,
    )

    if is_v7x and hasattr(pltpu, "CORE_PARALLEL"):
        dim_sem = (pltpu.CORE_PARALLEL,)     # actually shard tiles across the 2 TCs
    else:
        dim_sem = ("parallel",)

    partials = pl.pallas_call(
        kernel,
        out_shape=jax.ShapeDtypeStruct((num_tiles * 8, 2 * _LANES), jnp.float32),
        grid_spec=pl.GridSpec(
            grid=(num_tiles,),
            in_specs=[
                pl.BlockSpec((b_tile, c), lambda i: (i, 0)),   # student tile
                pl.BlockSpec((b_tile, c), lambda i: (i, 0)),   # teacher tile
                pl.BlockSpec((b_tile, 1), lambda i: (i, 0)),   # targets tile
            ],
            out_specs=pl.BlockSpec((8, 2 * _LANES), lambda i: (i, 0)),
        ),
        compiler_params=pltpu.CompilerParams(
            dimension_semantics=dim_sem,
            vmem_limit_bytes=vmem_limit,
        ),
        cost_estimate=cost,
    )(s_in, t_in, tgt2d)

    # Tiny final reduction + alpha blend in plain JAX.
    partials = partials.reshape(num_tiles, 8, 2 * _LANES)
    kl_sum = jnp.sum(partials[:, 0, 0])
    ce_sum = jnp.sum(partials[:, 0, _LANES])
    temp = jnp.float32(temperature)
    soft_loss = kl_sum / jnp.float32(b) * temp * temp
    hard_loss = ce_sum / jnp.float32(b)
    a = jnp.float32(alpha)
    return a * soft_loss + (jnp.float32(1.0) - a) * hard_loss


def _reference_loss(student_logits, teacher_logits, targets,
                    temperature=3.0, alpha=0.5):
    """Pure-JAX reference mirroring the PyTorch module, for verification."""
    T = temperature
    log_p_s_T = jax.nn.log_softmax(student_logits / T, axis=1)
    p_t = jax.nn.softmax(teacher_logits / T, axis=1)
    log_p_t = jax.nn.log_softmax(teacher_logits / T, axis=1)
    B = student_logits.shape[0]
    soft = jnp.sum(p_t * (log_p_t - log_p_s_T)) / B * (T ** 2)
    log_p_s = jax.nn.log_softmax(student_logits, axis=1)
    hard = -jnp.mean(jnp.take_along_axis(log_p_s, targets[:, None], axis=1))
    return alpha * soft + (1.0 - alpha) * hard


if __name__ == "__main__":
    alpha = 0.5
    base_key = jax.random.PRNGKey(0)

    def check(B, C, dtype=jnp.float32, temp=3.0, tile_budget=None, tol=1e-5):
        k1, k2, k3 = jax.random.split(jax.random.fold_in(base_key, 131 * B + C), 3)
        s = (jax.random.normal(k1, (B, C), dtype=jnp.float32) * 2.0).astype(dtype)
        t = (jax.random.normal(k2, (B, C), dtype=jnp.float32) * 2.0).astype(dtype)
        tg = jax.random.randint(k3, (B,), 0, C, dtype=jnp.int32)
        out = jax.block_until_ready(
            distillation_loss(s, t, tg, temp, alpha, tile_budget_bytes=tile_budget))
        ref = _reference_loss(s.astype(jnp.float32), t.astype(jnp.float32),
                              tg, temp, alpha)
        assert jnp.allclose(out, ref, rtol=tol, atol=tol), (B, C, str(dtype), temp, out, ref)

    check(16, 128)                                   # single-tile f32 path
    check(32, 128, tile_budget=60_000)               # forced 4-tile grid, (8,256) out blocks
    check(10, 37)                                    # padded batch + non-128 class count
    check(16, 128, dtype=jnp.bfloat16, tol=5e-4)     # bf16-input path (f32 math inside)
    check(16, 128, temp=1.0)                         # temperature == 1.0 specialization

    print("KERNEL_OK")
</pallas_src>

<mosaic_0001>
module attributes {stable_mosaic.version = 11 : i64} {
  func.func @_kd_partials_kernel(%arg0: i32, %arg1: memref<16x128xf32, #tpu.memory_space<vmem>>, %arg2: memref<16x128xf32, #tpu.memory_space<vmem>>, %arg3: memref<16x1xi32, #tpu.memory_space<vmem>>, %arg4: memref<8x256xf32, #tpu.memory_space<vmem>>) attributes {dimension_semantics = [#tpu.dimension_semantics<parallel>], iteration_bounds = array<i64: 1>, scalar_prefetch = 0 : i64, scratch_operands = 0 : i64, tpu.core_type = #tpu.core_type<tc>, window_params = [{transform_indices = @transform_0, window_bounds = array<i64: 16, 128>}, {transform_indices = @transform_1, window_bounds = array<i64: 16, 128>}, {transform_indices = @transform_2, window_bounds = array<i64: 16, 1>}, {transform_indices = @transform_3, window_bounds = array<i64: 8, 256>}]} {
    %c0 = arith.constant 0 : index
    %c0_0 = arith.constant 0 : index
    %0 = vector.load %arg1[%c0, %c0_0] : memref<16x128xf32, #tpu.memory_space<vmem>>, vector<16x128xf32>
    %c0_1 = arith.constant 0 : index
    %c0_2 = arith.constant 0 : index
    %1 = vector.load %arg2[%c0_1, %c0_2] : memref<16x128xf32, #tpu.memory_space<vmem>>, vector<16x128xf32>
    %cst = arith.constant dense<0xFF800000> : vector<16xf32>
    %2 = vector.multi_reduction <maximumf>, %0, %cst [1] : vector<16x128xf32> to vector<16xf32>
    %3 = vector.shape_cast %2 : vector<16xf32> to vector<16x1xf32>
    %4 = vector.broadcast %3 : vector<16x1xf32> to vector<16x128xf32>
    %5 = arith.subf %0, %4 : vector<16x128xf32>
    %6 = math.exp %5 : vector<16x128xf32>
    %cst_3 = arith.constant dense<0.000000e+00> : vector<16xf32>
    %7 = vector.multi_reduction <add>, %6, %cst_3 [1] : vector<16x128xf32> to vector<16xf32>
    %8 = vector.shape_cast %7 : vector<16xf32> to vector<16x1xf32>
    %9 = math.log %8 : vector<16x1xf32>
    %cst_4 = arith.constant 0.333333343 : f32
    %10 = vector.broadcast %cst_4 : f32 to vector<16x128xf32>
    %11 = arith.mulf %5, %10 : vector<16x128xf32>
    %12 = math.exp %11 : vector<16x128xf32>
    %cst_5 = arith.constant dense<0.000000e+00> : vector<16xf32>
    %13 = vector.multi_reduction <add>, %12, %cst_5 [1] : vector<16x128xf32> to vector<16xf32>
    %14 = vector.shape_cast %13 : vector<16xf32> to vector<16x1xf32>
    %15 = math.log %14 : vector<16x1xf32>
    %16 = vector.broadcast %15 : vector<16x1xf32> to vector<16x128xf32>
    %17 = arith.subf %11, %16 : vector<16x128xf32>
    %cst_6 = arith.constant 0.333333343 : f32
    %18 = vector.broadcast %cst_6 : f32 to vector<16x128xf32>
    %19 = arith.mulf %1, %18 : vector<16x128xf32>
    %cst_7 = arith.constant dense<0xFF800000> : vector<16xf32>
    %20 = vector.multi_reduction <maximumf>, %19, %cst_7 [1] : vector<16x128xf32> to vector<16xf32>
    %21 = vector.shape_cast %20 : vector<16xf32> to vector<16x1xf32>
    %22 = vector.broadcast %21 : vector<16x1xf32> to vector<16x128xf32>
    %23 = arith.subf %19, %22 : vector<16x128xf32>
    %24 = math.exp %23 : vector<16x128xf32>
    %cst_8 = arith.constant dense<0.000000e+00> : vector<16xf32>
    %25 = vector.multi_reduction <add>, %24, %cst_8 [1] : vector<16x128xf32> to vector<16xf32>
    %26 = vector.shape_cast %25 : vector<16xf32> to vector<16x1xf32>
    %27 = math.log %26 : vector<16x1xf32>
    %28 = arith.subf %23, %17 : vector<16x128xf32>
    %29 = vector.broadcast %27 : vector<16x1xf32> to vector<16x128xf32>
    %30 = arith.subf %28, %29 : vector<16x128xf32>
    %31 = arith.mulf %24, %30 : vector<16x128xf32>
    %cst_9 = arith.constant dense<0.000000e+00> : vector<16xf32>
    %32 = vector.multi_reduction <add>, %31, %cst_9 [1] : vector<16x128xf32> to vector<16xf32>
    %33 = vector.shape_cast %32 : vector<16xf32> to vector<16x1xf32>
    %34 = arith.divf %33, %26 : vector<16x1xf32>
    %c0_10 = arith.constant 0 : index
    %c0_11 = arith.constant 0 : index
    %35 = vector.load %arg3[%c0_10, %c0_11] : memref<16x1xi32, #tpu.memory_space<vmem>>, vector<16x1xi32>
    %36 = tpu.iota {dimensions = array<i32: 1>} : vector<16x128xi32>
    %37 = vector.broadcast %35 : vector<16x1xi32> to vector<16x128xi32>
    %38 = arith.cmpi eq, %36, %37 : vector<16x128xi32>
    %cst_12 = arith.constant 0.000000e+00 : f32
    %39 = vector.broadcast %cst_12 : f32 to vector<16x128xf32>
    %40 = arith.select %38, %0, %39 : vector<16x128xi1>, vector<16x128xf32>
    %cst_13 = arith.constant dense<0.000000e+00> : vector<16xf32>
    %41 = vector.multi_reduction <add>, %40, %cst_13 [1] : vector<16x128xf32> to vector<16xf32>
    %42 = vector.shape_cast %41 : vector<16xf32> to vector<16x1xf32>
    %43 = arith.addf %9, %3 : vector<16x1xf32>
    %44 = arith.subf %43, %42 : vector<16x1xf32>
    %45 = vector.shape_cast %34 : vector<16x1xf32> to vector<1x16x1xf32>
    %cst_14 = arith.constant dense<0.000000e+00> : vector<1xf32>
    %46 = vector.multi_reduction <add>, %45, %cst_14 [1, 2] : vector<1x16x1xf32> to vector<1xf32>
    %47 = vector.shape_cast %46 : vector<1xf32> to vector<1x1x1xf32>
    %48 = vector.extract %47[0, 0, 0] : f32 from vector<1x1x1xf32>
    %49 = vector.shape_cast %44 : vector<16x1xf32> to vector<1x16x1xf32>
    %cst_15 = arith.constant dense<0.000000e+00> : vector<1xf32>
    %50 = vector.multi_reduction <add>, %49, %cst_15 [1, 2] : vector<1x16x1xf32> to vector<1xf32>
    %51 = vector.shape_cast %50 : vector<1xf32> to vector<1x1x1xf32>
    %52 = vector.extract %51[0, 0, 0] : f32 from vector<1x1x1xf32>
    %53 = vector.broadcast %48 : f32 to vector<8x128xf32>
    %c0_16 = arith.constant 0 : index
    %c0_17 = arith.constant 0 : index
    %54 = vector.load %arg4[%c0_16, %c0_17] : memref<8x256xf32, #tpu.memory_space<vmem>>, vector<8x128xf32>
    tpu.vector_store %arg4[%c0_16, %c0_17], %53 {strides = array<i32>} : memref<8x256xf32, #tpu.memory_space<vmem>>, vector<8x128xf32>,
    %55 = vector.broadcast %52 : f32 to vector<8x128xf32>
    %c0_18 = arith.constant 0 : index
    %c128 = arith.constant 128 : index
    %56 = vector.load %arg4[%c0_18, %c128] : memref<8x256xf32, #tpu.memory_space<vmem>>, vector<8x128xf32>
    tpu.vector_store %arg4[%c0_18, %c128], %55 {strides = array<i32>} : memref<8x256xf32, #tpu.memory_space<vmem>>, vector<8x128xf32>,
    return
  }
  func.func @transform_0(%arg0: i32) -> (i32, i32) {
    %c0_i32 = arith.constant 0 : i32
    %c0_i32_0 = arith.constant 0 : i32
    return %arg0, %c0_i32 : i32, i32
  }
  func.func @transform_1(%arg0: i32) -> (i32, i32) {
    %c0_i32 = arith.constant 0 : i32
    %c0_i32_0 = arith.constant 0 : i32
    return %arg0, %c0_i32 : i32, i32
  }
  func.func @transform_2(%arg0: i32) -> (i32, i32) {
    %c0_i32 = arith.constant 0 : i32
    %c0_i32_0 = arith.constant 0 : i32
    return %arg0, %c0_i32 : i32, i32
  }
  func.func @transform_3(%arg0: i32) -> (i32, i32) {
    %c0_i32 = arith.constant 0 : i32
    %c0_i32_0 = arith.constant 0 : i32
    return %arg0, %c0_i32 : i32, i32
  }
}

</mosaic_0001>

<bundles_post_ra>
// kernel: tpu_custom_call.1
= control target key start
LH: loop header
LB: loop body
LE: loop exit
PB: predicated region body
PF: predicated region fallthrough
CT: control target
= control target key end

     0   :  { %8 = vsyncpa [#allocation3], 0  ;;  %s439_s0 = inlined_call_operand.hbm [shape: f32[16,128], index: 0, kind: input, shape index: {}]   ;;  %s440_s1 = inlined_call_operand.hbm [shape: f32[16,128], index: 1, kind: input, shape index: {}]   ;;  %s441_s2 = inlined_call_operand.hbm [shape: s32[16,1], index: 2, kind: input, shape index: {}]   ;;  %s442_s3 = inlined_call_operand.hbm [shape: f32[8,256], index: 3, kind: output, shape index: {}]  }
   0x1   :  { %9 = vsyncpa [#allocation6], 0 }
   0x2   :  { %10 = vsyncpa [#allocation4], 0  ;;  %s330_s12 = smov [#allocation5]   ;;  %s331_s14 = smov [#allocation2]  }
   0x3   :  { %s28_s13 = sshll.u32 %s330_s12, 4  ;;  %s16_s15 = sshll.u32 %s331_s14, 4  ;;  %s29_s13 = int_to_ptr.vmem [resolvable:$true] %s28_s13  ;;  %s357_s15 = int_to_ptr.vmem [resolvable:$true] %s16_s15 }
   0x4   :  { %s236_s18 = scalar_lea.hbm %s440_s1, 256 }
   0x5   :  { %p237_p0 = scmp.ne.s32.totalorder %s440_s1, %s236_s18  ;;  %p240_p1 = scmp.lt.u32.totalorder %s236_s18, %s440_s1 }
   0x7   :  { %p242_p2 = pnand %p240_p1, %p237_p0 }
   0x9   :  { %245 = shalt.err (!%p242_p2)
}
   0xa   :  { %s246_s23 = scalar_lea.vmem %s29_s13, 256  ;;  %p251_p4 = scmp.lt.s32.totalorder %s29_s13, %s29_s13 }
   0xb   :  { %p247_p3 = scmp.ne.s32.totalorder %s29_s13, %s246_s23  ;;  %p252_p5 = scmp.lt.s32.totalorder %s246_s23, %s246_s23 }
   0xd   :  { %p253_p6 = por %p252_p5, %p251_p4 }
   0xf   :  { %p254_p7 = pnand %p253_p6, %p247_p3 }
  0x11   :  { %257 = shalt.err (!%p254_p7)
}
  0x12   :  { %s332_s24 = smov 128   ;;  %s333_s25 = smov 8  }
  0x13   :  { %34 = dma.hbm_to_vmem [thread:$0]  %s440_s1, 256, %s29_s13, [#allocation6], %s332_s24, %s332_s24, %s333_s25  }
  0x14   :  { %s258_s30 = scalar_lea.hbm %s439_s0, 256 }
  0x15   :  { %p259_p8 = scmp.ne.s32.totalorder %s439_s0, %s258_s30  ;;  %p262_p9 = scmp.lt.u32.totalorder %s258_s30, %s439_s0 }
  0x17   :  { %p264_p10 = pnand %p262_p9, %p259_p8 }
  0x19   :  { %267 = shalt.err (!%p264_p10)
}
  0x1a   :  { %s268_s8 = scalar_lea.vmem %s357_s15, 256  ;;  %p273_p12 = scmp.lt.s32.totalorder %s357_s15, %s357_s15 }
  0x1b   :  { %p269_p11 = scmp.ne.s32.totalorder %s357_s15, %s268_s8  ;;  %p274_p13 = scmp.lt.s32.totalorder %s268_s8, %s268_s8 }
  0x1d   :  { %p275_p0 = por %p274_p13, %p273_p12 }
  0x1f   :  { %p276_p1 = pnand %p275_p0, %p269_p11 }
  0x21   :  { %279 = shalt.err (!%p276_p1)
}
  0x22   :  { %22 = dma.hbm_to_vmem [thread:$0]  %s439_s0, 256, %s357_s15, [#allocation3], %s332_s24, %s332_s24, %s333_s25  }
  0x23   :  { %s334_s10 = smov [#allocation7]   ;;  %s280_s14 = scalar_lea.hbm %s441_s2, 256 }
  0x24   :  { %s40_s11 = sshll.u32 %s334_s10, 4  ;;  %p281_p2 = scmp.ne.s32.totalorder %s441_s2, %s280_s14  ;;  %s41_s11 = int_to_ptr.vmem [resolvable:$true] %s40_s11 }
  0x25   :  { %p284_p3 = scmp.lt.u32.totalorder %s280_s14, %s441_s2 }
  0x27   :  { %p286_p4 = pnand %p284_p3, %p281_p2 }
  0x29   :  { %289 = shalt.err (!%p286_p4)
}
  0x2a   :  { %s290_s20 = scalar_lea.vmem %s41_s11, 256  ;;  %p295_p6 = scmp.lt.s32.totalorder %s41_s11, %s41_s11 }
  0x2b   :  { %p291_p5 = scmp.ne.s32.totalorder %s41_s11, %s290_s20  ;;  %p296_p7 = scmp.lt.s32.totalorder %s290_s20, %s290_s20 }
  0x2d   :  { %p297_p8 = por %p296_p7, %p295_p6 }
  0x2f   :  { %p298_p9 = pnand %p297_p8, %p291_p5 }
  0x31   :  { %301 = shalt.err (!%p298_p9)
}
  0x32   :  { %46 = dma.hbm_to_vmem [thread:$0]  %s441_s2, 256, %s41_s11, [#allocation6], %s332_s24, %s332_s24, %s333_s25  }
  0x33   :  { %324 = dma.done.wait [#allocation3], 256  }
  0x34   :  { %325 = vsyncadd [#allocation3], 4294967040 }
  0x35   :  { %326 = dma.done.wait [#allocation6], 512  }
  0x36   :  { %327 = vsyncadd [#allocation6], 4294966784  ;;  %v409_v0 = vld [vmem:[#allocation2] sm:$0xff]  ;;  %v58_v1 = vld [vmem:[#allocation5] sm:$0xff]  ;;  %v335_v6 = vmov 0   ;;  %v130_v34 = vlaneseq  ;;  %vm150_vm2 = vcmask 7168  }
  0x37   :  { %60 = vmax.xlane.f32.xlu0 %v409_v0  ;;  %v94_v2 = vmul.f32 0.33333334, %v58_v1  ;;  %v59_v3 = vld [vmem:[#allocation5 + $0x8] sm:$0xff]  ;;  %v412_v4 = vld [vmem:[#allocation2 + $0x8] sm:$0xff]  ;;  %207 = vset.pattern.permute.xlu1 %v335_v6  ;;  %v128_v26 = vld [vmem:[#allocation7] sm:$0xff]  ;;  %s336_s21 = smov [#allocation8]  }
  0x38   :  { %v95_v5 = vmul.f32 0.33333334, %v59_v3  ;;  %206 = vset.pattern.permute.xlu0 %v335_v6  ;;  %v129_v25 = vld [vmem:[#allocation7 + $0x8] sm:$0xff]  ;;  %v131_v36 = vand.u32 127, %v130_v34  ;;  %s185_s22 = sshll.u32 %s336_s21, 4  ;;  %s186_s22 = int_to_ptr.vmem [resolvable:$true] %s185_s22 }
  0x39   :  { %96 = vmax.xlane.f32.xlu1 %v94_v2  ;;  %s302_s24 = scalar_lea.vmem %s186_s22, 256  ;;  %p307_p11 = scmp.lt.s32.totalorder %s186_s22, %s186_s22 }
  0x3a   :  { %p303_p10 = scmp.ne.s32.totalorder %s186_s22, %s302_s24  ;;  %p308_p12 = scmp.lt.s32.totalorder %s302_s24, %s302_s24 }
  0x3b   :  { %62 = vmax.xlane.f32.xlu0 %v412_v4 }
  0x3c   :  { %p309_p13 = por %p308_p12, %p307_p11 }
  0x3d   :  { %98 = vmax.xlane.f32.xlu1 %v95_v5 }
  0x3e   :  { %p310_p0 = pnand %p309_p13, %p303_p10 }
  0xc4   :  { %v415_v7 = vpop.xlane.xlu0 %60 }
  0xc5   :  { %v64_v8 = vsub.f32 %v409_v0, %v415_v7 }
  0xc6   :  { %v97_v9 = vpop.xlane.xlu1 %96 }
  0xc7   :  { %v78_v10 = vmul.f32 0.33333334, %v64_v8  ;;  %v100_v11 = vsub.f32 %v94_v2, %v97_v9  ;;  %v66_v28 = vmul.f32 1.442695, %v64_v8 }
  0xc8   :  { %v419_v12 = vpop.xlane.xlu0 %62 }
  0xc9   :  { %v80_v13 = vmul.f32 1.442695, %v78_v10  ;;  %v65_v14 = vsub.f32 %v412_v4, %v419_v12  ;;  %v102_v15 = vmul.f32 1.442695, %v100_v11 }
  0xca   :  { %v99_v16 = vpop.xlane.xlu1 %98 }
  0xcb   :  { %208 = vpow2.f32 %v80_v13  ;;  %v79_v17 = vmul.f32 0.33333334, %v65_v14  ;;  %v101_v18 = vsub.f32 %v95_v5, %v99_v16  ;;  %v68_v27 = vmul.f32 1.442695, %v65_v14 }
  0xcc   :  { %210 = vpow2.f32 %v102_v15 }
  0xcd   :  { %v82_v19 = vmul.f32 1.442695, %v79_v17  ;;  %v104_v20 = vmul.f32 1.442695, %v101_v18 }
  0xcf   :  { %212 = vpow2.f32 %v82_v19 }
  0xd0   :  { %214 = vpow2.f32 %v104_v20 }
  0xd1   :  { %216 = vpow2.f32 %v68_v27 }
  0xd2   :  { %218 = vpow2.f32 %v66_v28 }
  0xd5   :  { %v209_v21 = vpop.eup %208 }
  0xd6   :  { %84 = vadd.xlane.f32.xlu0 %v209_v21  ;;  %v211_v22 = vpop.eup %210 }
  0xd9   :  { %v213_v23 = vpop.eup %212 }
  0xda   :  { %106 = vadd.xlane.f32.xlu0 %v211_v22  ;;  %86 = vadd.xlane.f32.xlu1 %v213_v23  ;;  %v215_v24 = vpop.eup %214 }
  0xdb   :  { %v217_v29 = vpop.eup %216 }
  0xdc   :  { %v219_v30 = vpop.eup %218 }
  0xde   :  { %108 = vadd.xlane.f32.xlu1 %v215_v24 }
  0xef   :  { %136 = vperm.xlu1 %207, %v129_v25  }
  0xf0   :  { %133 = vperm.xlu0 %206, %v128_v26  }
 0x10f   :  { %72 = vadd.xlane.f32.xlu0 %v217_v29 }
 0x113   :  { %70 = vadd.xlane.f32.xlu1 %v219_v30 }
 0x163   :  { %v85_v31 = vpop.xlane.xlu0 %84 }
 0x164   :  { %220 = vlog2.f32 %v85_v31 }
 0x167   :  { %v87_v32 = vpop.xlane.xlu1 %86  ;;  %v107_v33 = vpop.xlane.xlu0 %106 }
 0x168   :  { %222 = vlog2.f32 %v87_v32 }
 0x169   :  { %224 = vlog2.f32 %v107_v33 }
 0x16b   :  { %v109_v35 = vpop.xlane.xlu1 %108 }
 0x16c   :  { %226 = vlog2.f32 %v109_v35 }
 0x16e   :  { %v221_v37 = vpop.eup %220 }
 0x16f   :  { %v89_v38 = vmul.f32 0.6931472, %v221_v37  ;;  %v134_v39 = vpop.permute.xlu0 %133  ;;  %v137_v54 = vpop.permute.xlu1 %136 }
 0x170   :  { %vm138_vm0 = vcmp.eq.s32.totalorder %v131_v36, %v134_v39  ;;  %vm139_vm1 = vcmp.eq.s32.totalorder %v131_v36, %v137_v54 }
 0x171   :  { %v92_v40 = vsub.f32 %v78_v10, %v89_v38  ;;  %v140_v41 = vsel %vm138_vm0, %v409_v0, 0.0  ;;  %v141_v56 = vsel %vm139_vm1, %v412_v4, 0.0 }
 0x172   :  { %v223_v42 = vpop.eup %222  ;;  %142 = vadd.xlane.f32.xlu1 %v140_v41 }
 0x173   :  { %v225_v43 = vpop.eup %224  ;;  %v91_v44 = vmul.f32 0.6931472, %v223_v42  ;;  %v114_v45 = vsub.f32 %v100_v11, %v92_v40 }
 0x174   :  { %v111_v46 = vmul.f32 0.6931472, %v225_v43 }
 0x175   :  { %v93_v47 = vsub.f32 %v79_v17, %v91_v44 }
 0x176   :  { %v227_v48 = vpop.eup %226  ;;  %v116_v49 = vsub.f32 %v114_v45, %v111_v46 }
 0x177   :  { %v113_v50 = vmul.f32 0.6931472, %v227_v48  ;;  %v115_v51 = vsub.f32 %v101_v18, %v93_v47 }
 0x178   :  { %v118_v52 = vmul.f32 %v211_v22, %v116_v49 }
 0x179   :  { %v117_v53 = vsub.f32 %v115_v51, %v113_v50 }
 0x17a   :  { %120 = vadd.xlane.f32.xlu1 %v118_v52 }
 0x17b   :  { %v119_v55 = vmul.f32 %v215_v24, %v117_v53 }
 0x17e   :  { %122 = vadd.xlane.f32.xlu1 %v119_v55 }
 0x182   :  { %144 = vadd.xlane.f32.xlu1 %v141_v56 }
 0x19c   :  { %v73_v58 = vpop.xlane.xlu0 %72 }
 0x1a0   :  { %v71_v57 = vpop.xlane.xlu1 %70 }
 0x1a1   :  { %228 = vlog2.f32 %v71_v57 }
 0x1a2   :  { %230 = vlog2.f32 %v73_v58 }
 0x1a3   :  { %232 = vrcp.f32 %v107_v33 }
 0x1a4   :  { %234 = vrcp.f32 %v109_v35 }
 0x1ab   :  { %v229_v60 = vpop.eup %228 }
 0x1ac   :  { %v231_v61 = vpop.eup %230  ;;  %v75_v63 = vmul.f32 0.6931472, %v229_v60 }
 0x1ad   :  { %v233_v0 = vpop.eup %232  ;;  %v77_v1 = vmul.f32 0.6931472, %v231_v61 }
 0x1ae   :  { %v235_v3 = vpop.eup %234  ;;  %v146_v6 = vadd.f32 %v75_v63, %v415_v7 }
 0x1af   :  { %v147_v9 = vadd.f32 %v77_v1, %v419_v12 }
 0x1ff   :  { %v143_v59 = vpop.xlane.xlu1 %142 }
 0x200   :  { %v148_v8 = vsub.f32 %v146_v6, %v143_v59 }
 0x202   :  { %v163_v16 = vsel %vm150_vm2, %v148_v8, 0.0 }
 0x207   :  { %v121_v62 = vpop.xlane.xlu1 %120 }
 0x208   :  { %v125_v2 = vmul.f32 %v233_v0, %v121_v62 }
 0x20a   :  { %v151_v10 = vsel %vm150_vm2, %v125_v2, 0.0 }
 0x20b   :  { %v123_v5 = vpop.xlane.xlu1 %122 }
 0x20c   :  { %v127_v4 = vmul.f32 %v235_v3, %v123_v5 }
 0x20e   :  { %v152_v11 = vsel %vm150_vm2, %v127_v4, 0.0 }
 0x20f   :  { %v145_v13 = vpop.xlane.xlu1 %144  ;;  %v153_v14 = vadd.f32 %v152_v11, %v151_v10 }
 0x210   :  { %v149_v15 = vsub.f32 %v147_v9, %v145_v13 }
 0x211   :  { %154 = vadd.xlane.f32.xlu1 %v153_v14 }
 0x212   :  { %v164_v17 = vsel %vm150_vm2, %v149_v15, 0.0 }
 0x213   :  { %v165_v18 = vadd.f32 %v164_v17, %v163_v16 }
 0x215   :  { %166 = vadd.xlane.f32.xlu1 %v165_v18 }
 0x29e   :  { %v155_v19 = vpop.xlane.xlu1 %154 }
 0x29f   :  { %v156_v20 = vrot.slane %v155_v19, 4 }
 0x2a1   :  { %v157_v21 = vadd.f32 %v156_v20, %v155_v19 }
 0x2a2   :  { %v167_v22 = vpop.xlane.xlu1 %166 }
 0x2a3   :  { %v158_v7 = vrot.slane %v157_v21, 2  ;;  %v168_v23 = vrot.slane %v167_v22, 4 }
 0x2a5   :  { %v169_v24 = vadd.f32 %v168_v23, %v167_v22  ;;  %v159_v25 = vadd.f32 %v158_v7, %v157_v21 }
 0x2a7   :  { %v170_v26 = vrot.slane %v169_v24, 2  ;;  %v160_v12 = vrot.slane %v159_v25, 1 }
 0x2a9   :  { %v171_v27 = vadd.f32 %v170_v26, %v169_v24  ;;  %v161_v28 = vadd.f32 %v160_v12, %v159_v25 }
 0x2ab   :  { %195 = vpush %v161_v28  ;;  %v172_v29 = vrot.slane %v171_v27, 1 }
 0x2ad   :  { %v173_v30 = vadd.f32 %v172_v29, %v171_v27 }
 0x2af   :  { %197 = vpush %v173_v30 }
 0x2dc   :  { %s196_s2 = spop %195 }
 0x2dd   :  { %v175_v31 = vstv %s196_s2 }
 0x2de   :  { %176 = vst [vmem:[#allocation8] sm:$0xff] %v175_v31 }
 0x2e0   :  { %s198_s23 = spop %197 }
 0x2e1   :  { %v177_v32 = vstv %s198_s23 }
 0x2e2   :  { %178 = vst [vmem:[#allocation8 + $0x8] sm:$0xff] %v177_v32 }
 0x2e3   :  { %313 = shalt.err (!%p310_p0)
}
 0x2e4   :  { %s314_s27 = scalar_lea.hbm %s442_s3, 256 }
 0x2e5   :  { %p315_p1 = scmp.ne.s32.totalorder %s442_s3, %s314_s27  ;;  %p318_p2 = scmp.lt.u32.totalorder %s314_s27, %s442_s3 }
 0x2e7   :  { %p320_p3 = pnand %p318_p2, %p315_p1 }
 0x2e9   :  { %323 = shalt.err (!%p320_p3)
}
 0x2ea   :  { %188 = dma.vmem_to_hbm [thread:$0]  %s186_s22, 256, %s442_s3, [#allocation4]  }
 0x2eb   :  { %328 = dma.done.wait [#allocation4], 256  }
 0x2ec   :  { %329 = vsyncadd [#allocation4], 4294967040 }
 0x2ed   :  { %192 = vsyncpa [#allocation3], 1 }
 0x2ee   :  { %193 = vsyncpa [#allocation6], 1 }
 0x2ef   :  { %194 = vsyncpa [#allocation4], 1 }

</bundles_post_ra>
